<compile_context>
chip_gen: v7x
topology: tpu7x:2x2x1
jax: 0.10.0
libtpu: 0.0.40
codegen_flags: <defaults>
</compile_context>

<pallas_src>
import math

import jax
import jax.numpy as jnp
from jax.experimental import pallas as pl
from jax.experimental.pallas import tpu as pltpu


def _round_up(x: int, m: int) -> int:
    return ((x + m - 1) // m) * m


def _is_v5_tpu() -> bool:
    try:
        return "v5" in jax.devices()[0].device_kind.lower()
    except Exception:
        return False


def _make_kernel(tb, tv, chunk, S, E_pad, counts_dtype):
    """Grid = (vocab_tiles, batch_tiles); vocab (reduction) is the OUTER axis so
    every embedding tile is fetched from HBM exactly once."""
    use_unrolled = S <= 16   # small static S: fully unroll the token loop

    def kernel(ids_ref, len_ref, emb_ref, w_ref, b_ref, out_ref, acc_ref):
        k = pl.program_id(0)          # vocab tile (outer, sequential reduction)
        i = pl.program_id(1)          # batch tile (inner)

        @pl.when(k == 0)
        def _():
            acc_ref[i] = jnp.zeros((tb, E_pad), jnp.float32)

        if use_unrolled:
            ids = ids_ref[...]        # (tb, S) int32, already length-masked (-1)

        v_base = k * tv
        # Process the vocab tile in MXU-native K chunks so the counts working
        # set stays small and the VPU (counts) overlaps the MXU (matmul).
        for c0 in range(0, tv, chunk):
            cs = min(chunk, tv - c0)
            vocab_ids = (v_base + c0
                         + jax.lax.broadcasted_iota(jnp.int32, (tb, cs), 1))
            counts = jnp.zeros((tb, cs), counts_dtype)
            if use_unrolled:
                for s in range(S):
                    counts = counts + (vocab_ids == ids[:, s:s + 1]).astype(counts_dtype)
            else:
                # TODO(synk): tune the unroll factor for long sequences.
                def body(s, c):
                    tok = ids_ref[:, pl.ds(s, 1)]
                    return c + (vocab_ids == tok).astype(counts_dtype)
                counts = jax.lax.fori_loop(0, S, body, counts, unroll=4)

            # Masked sum-pool over this vocab chunk == counts @ table chunk.
            acc_ref[i] = acc_ref[i] + jnp.dot(
                counts.astype(emb_ref.dtype), emb_ref[c0:c0 + cs, :],
                preferred_element_type=jnp.float32)

        @pl.when(k == pl.num_programs(0) - 1)
        def _():
            # Exact f32 division by the sequence length (mean pool).
            feats = acc_ref[i] / len_ref[...]
            # TODO(synk): dropout is identity at inference; training-mode
            # stochastic dropout is not implemented in-kernel.
            logits = jnp.dot(feats, w_ref[...],
                             preferred_element_type=jnp.float32) + b_ref[...]
            out_ref[...] = logits.astype(out_ref.dtype)

    return kernel


def prepare_params(embedding, classifier_weight, classifier_bias, *,
                   table_dtype=jnp.bfloat16, vocab_tile=None, vocab_chunk=None):
    """One-time (weight-load time) padding / casting of the model parameters.

    embedding:         (V, E) float
    classifier_weight: (C, E) float   (PyTorch nn.Linear layout)
    classifier_bias:   (C,)   float

    Note: the table is stored in bf16 by default (halves HBM traffic); pass
    table_dtype=jnp.float32 for exact f32 parity with PyTorch.
    """
    V, E = embedding.shape
    C, E2 = classifier_weight.shape
    assert E2 == E
    E_pad = _round_up(E, 128)
    C_pad = _round_up(C, 128)

    v5 = _is_v5_tpu()
    # MXU-native K chunk: 128 on v5e, 256 on v6e/v7x.
    chunk = int(vocab_chunk) if vocab_chunk else (128 if v5 else 256)
    # Counts are built on the VPU: bf16 where the VPU supports it (v6e/v7x).
    counts_dtype = jnp.float32 if v5 else jnp.bfloat16

    # Vocab tile: large enough to amortize per-step overhead with big
    # contiguous DMAs, small enough that the double-buffered table tile is
    # cheap in VMEM (tv * E_pad * 2 bytes per buffer).
    tv = int(vocab_tile) if vocab_tile else min(_round_up(V, 128), 2048)
    V_pad = _round_up(V, tv)

    emb_p = jnp.zeros((V_pad, E_pad), table_dtype).at[:V, :E].set(
        jnp.asarray(embedding).astype(table_dtype))
    w_p = jnp.zeros((E_pad, C_pad), jnp.float32).at[:E, :C].set(
        jnp.asarray(classifier_weight, jnp.float32).T)
    b_p = jnp.zeros((1, C_pad), jnp.float32).at[0, :C].set(
        jnp.asarray(classifier_bias, jnp.float32))

    return dict(emb=emb_p, w=w_p, b=b_p, num_classes=C,
                vocab_tile=tv, vocab_chunk=chunk, counts_dtype=counts_dtype)


def news_headline_classifier(input_ids, lengths, params, *, batch_tile=None):
    """input_ids: (B, S) int; lengths: (B,) int or None. Returns (B, C) f32 logits."""
    B, S = input_ids.shape
    if lengths is None:
        lengths = jnp.full((B,), S, jnp.int32)    # reference: plain mean over S

    emb_p, w_p, b_p = params["emb"], params["w"], params["b"]
    V_pad, E_pad = emb_p.shape
    _, C_pad = w_p.shape
    C = params["num_classes"]
    tv = params["vocab_tile"]
    chunk = params["vocab_chunk"]
    counts_dtype = params["counts_dtype"]

    # Batch tile: multiple of 8 sublanes, capped at 128 (MXU-native M).
    # TODO(synk): on v7x either mark the batch axis "parallel" with >=2 batch
    # tiles, or split the vocab reduction across the two TensorCores with
    # per-core accumulators + final add, to occupy both cores.
    tb = int(batch_tile) if batch_tile else min(_round_up(B, 8), 128)
    B_pad = _round_up(B, tb)
    nb = B_pad // tb
    nv = V_pad // tv

    # Fold the validity mask into the ids on the host: positions >= length (and
    # batch-padding rows) become -1 and can never match a vocabulary id, so the
    # kernel does no per-vocab-tile mask work (hoisted loop invariant).
    ids = jnp.asarray(input_ids, jnp.int32)
    lens = jnp.asarray(lengths, jnp.int32)
    pos = jnp.arange(S, dtype=jnp.int32)[None, :]
    masked_ids = jnp.where(pos < lens[:, None], ids, -1)
    ids_p = jnp.full((B_pad, S), -1, jnp.int32).at[:B].set(masked_ids)
    len_p = jnp.ones((B_pad, 1), jnp.float32).at[:B, 0].set(lens.astype(jnp.float32))

    kernel = _make_kernel(tb, tv, chunk, S, E_pad, counts_dtype)

    out = pl.pallas_call(
        kernel,
        out_shape=jax.ShapeDtypeStruct((B_pad, C_pad), jnp.float32),
        grid_spec=pltpu.PrefetchScalarGridSpec(
            num_scalar_prefetch=0,
            grid=(nv, nb),                        # vocab outer => one table pass
            in_specs=[
                pl.BlockSpec((tb, S), lambda k, i: (i, 0)),          # masked ids
                pl.BlockSpec((tb, 1), lambda k, i: (i, 0)),          # lengths (f32)
                pl.BlockSpec((tv, E_pad), lambda k, i: (k, 0)),      # table tile
                pl.BlockSpec((E_pad, C_pad), lambda k, i: (0, 0)),   # W^T (resident)
                pl.BlockSpec((1, C_pad), lambda k, i: (0, 0)),       # bias (resident)
            ],
            out_specs=pl.BlockSpec((tb, C_pad), lambda k, i: (i, 0)),
            scratch_shapes=[pltpu.VMEM((nb, tb, E_pad), jnp.float32)],  # feature acc
        ),
        compiler_params=pltpu.CompilerParams(
            # Vocab is a sequential reduction; batch tiles are independent but
            # kept "arbitrary" because the shared scratch accumulator is indexed
            # by the batch-tile id (single-TC v5e/v6e gain nothing from
            # "parallel" anyway; see TODO above for v7x).
            dimension_semantics=("arbitrary", "arbitrary"),
        ),
    )(ids_p, len_p, emb_p, w_p, b_p)

    return out[:B, :C]


def _xavier_uniform(key, shape, fan_in, fan_out, dtype=jnp.float32):
    bound = math.sqrt(6.0 / (fan_in + fan_out))
    return jax.random.uniform(key, shape, dtype, minval=-bound, maxval=bound)


if __name__ == "__main__":
    # Small, module-consistent shapes.
    vocab_size = 128
    embedding_dim = 32
    num_classes = 4
    batch = 2
    seq_len = 8
    padding_idx = 0

    key = jax.random.PRNGKey(0)
    k_emb, k_w, k_ids, k_len = jax.random.split(key, 4)

    # Parameters (xavier-uniform like the module's _init_weights, zero bias).
    embedding = _xavier_uniform(k_emb, (vocab_size, embedding_dim),
                                vocab_size, embedding_dim)
    embedding = embedding.at[padding_idx].set(0.0)          # padding_idx row zeroed
    weight = _xavier_uniform(k_w, (num_classes, embedding_dim),
                             embedding_dim, num_classes)    # (C, E) PyTorch layout
    bias = jnp.zeros((num_classes,), jnp.float32)

    # Inputs: token ids with padding beyond `lengths` (lengths >= 1).
    lengths = jax.random.randint(k_len, (batch,), 3, seq_len + 1, dtype=jnp.int32)
    ids = jax.random.randint(k_ids, (batch, seq_len), 1, vocab_size, dtype=jnp.int32)
    pos = jnp.arange(seq_len)[None, :]
    ids = jnp.where(pos < lengths[:, None], ids, padding_idx)

    params = prepare_params(embedding, weight, bias)        # one-time weight prep
    logits = news_headline_classifier(ids, lengths, params)
    logits = jax.block_until_ready(logits)

    # Pure-JAX reference. The kernel stores the table in bf16 (halves HBM
    # traffic); the reference uses the same rounded table so the only residual
    # error is f32 accumulation order.
    emb_used = embedding.astype(jnp.bfloat16).astype(jnp.float32)
    emb_rows = emb_used[ids]                                           # (B, S, E)
    mask = (pos < lengths[:, None]).astype(jnp.float32)[..., None]     # (B, S, 1)
    feats = (emb_rows * mask).sum(1) / lengths[:, None].astype(jnp.float32)
    ref = feats @ weight.T + bias

    assert logits.shape == (batch, num_classes)
    assert jnp.allclose(logits, ref, atol=1e-3, rtol=1e-3), (logits, ref)

    print("KERNEL_OK")
</pallas_src>

<mosaic_0001>
module attributes {stable_mosaic.version = 11 : i64} {
  func.func @kernel(%arg0: i32, %arg1: i32, %arg2: memref<8x8xi32, #tpu.memory_space<vmem>>, %arg3: memref<8x1xf32, #tpu.memory_space<vmem>>, %arg4: memref<128x128xbf16, #tpu.memory_space<vmem>>, %arg5: memref<128x128xf32, #tpu.memory_space<vmem>>, %arg6: memref<1x128xf32, #tpu.memory_space<vmem>>, %arg7: memref<8x128xf32, #tpu.memory_space<vmem>>, %arg8: memref<1x8x128xf32, #tpu.memory_space<vmem>>) attributes {dimension_semantics = [#tpu.dimension_semantics<arbitrary>, #tpu.dimension_semantics<arbitrary>], iteration_bounds = array<i64: 1, 1>, scalar_prefetch = 0 : i64, scratch_operands = 1 : i64, tpu.core_type = #tpu.core_type<tc>, window_params = [{transform_indices = @transform_0, window_bounds = array<i64: 8, 8>}, {transform_indices = @transform_1, window_bounds = array<i64: 8, 1>}, {transform_indices = @transform_2, window_bounds = array<i64: 128, 128>}, {pipeline_mode = #tpu.pipeline_mode<synchronous>, transform_indices = @transform_3, window_bounds = array<i64: 128, 128>}, {pipeline_mode = #tpu.pipeline_mode<synchronous>, transform_indices = @transform_4, window_bounds = array<i64: 1, 128>}, {transform_indices = @transform_5, window_bounds = array<i64: 8, 128>}]} {
    %c0_i32 = arith.constant 0 : i32
    %0 = arith.cmpi eq, %arg0, %c0_i32 : i32
    %1 = arith.extui %0 : i1 to i32
    %c0_i32_0 = arith.constant 0 : i32
    %2 = arith.cmpi ne, %1, %c0_i32_0 : i32
    scf.if %2 {
      %cst_12 = arith.constant 0.000000e+00 : f32
      %79 = vector.broadcast %cst_12 : f32 to vector<8x128xf32>
      %80 = arith.index_cast %arg1 : i32 to index
      %c0_13 = arith.constant 0 : index
      %c0_14 = arith.constant 0 : index
      %81 = vector.load %arg8[%80, %c0_13, %c0_14] : memref<1x8x128xf32, #tpu.memory_space<vmem>>, vector<1x8x128xf32>
      %82 = vector.shape_cast %81 : vector<1x8x128xf32> to vector<8x128xf32>
      %83 = vector.shape_cast %79 : vector<8x128xf32> to vector<1x8x128xf32>
      tpu.vector_store %arg8[%80, %c0_13, %c0_14], %83 {strides = array<i32>} : memref<1x8x128xf32, #tpu.memory_space<vmem>>, vector<1x8x128xf32>,
    } else {
    }
    %c0 = arith.constant 0 : index
    %c0_1 = arith.constant 0 : index
    %3 = vector.load %arg2[%c0, %c0_1] : memref<8x8xi32, #tpu.memory_space<vmem>>, vector<8x8xi32>
    %c128_i32 = arith.constant 128 : i32
    %4 = arith.muli %arg0, %c128_i32 : i32
    %c0_i32_2 = arith.constant 0 : i32
    %5 = arith.addi %4, %c0_i32_2 : i32
    %6 = tpu.iota {dimensions = array<i32: 1>} : vector<8x128xi32>
    %7 = vector.broadcast %5 : i32 to vector<8x128xi32>
    %8 = arith.addi %7, %6 : vector<8x128xi32>
    %cst = arith.constant 0.000000e+00 : bf16
    %9 = vector.broadcast %cst : bf16 to vector<8x128xbf16>
    %10 = vector.extract_strided_slice %3 {offsets = [0, 0], sizes = [8, 1], strides = [1, 1]} : vector<8x8xi32> to vector<8x1xi32>
    %11 = vector.broadcast %10 : vector<8x1xi32> to vector<8x128xi32>
    %12 = arith.cmpi eq, %8, %11 : vector<8x128xi32>
    %13 = arith.extui %12 : vector<8x128xi1> to vector<8x128xi32>
    %14 = arith.sitofp %13 : vector<8x128xi32> to vector<8x128xf32>
    %15 = arith.truncf %14 : vector<8x128xf32> to vector<8x128xbf16>
    %16 = arith.addf %9, %15 : vector<8x128xbf16>
    %17 = vector.extract_strided_slice %3 {offsets = [0, 1], sizes = [8, 1], strides = [1, 1]} : vector<8x8xi32> to vector<8x1xi32>
    %18 = vector.broadcast %17 : vector<8x1xi32> to vector<8x128xi32>
    %19 = arith.cmpi eq, %8, %18 : vector<8x128xi32>
    %20 = arith.extui %19 : vector<8x128xi1> to vector<8x128xi32>
    %21 = arith.sitofp %20 : vector<8x128xi32> to vector<8x128xf32>
    %22 = arith.truncf %21 : vector<8x128xf32> to vector<8x128xbf16>
    %23 = arith.addf %16, %22 : vector<8x128xbf16>
    %24 = vector.extract_strided_slice %3 {offsets = [0, 2], sizes = [8, 1], strides = [1, 1]} : vector<8x8xi32> to vector<8x1xi32>
    %25 = vector.broadcast %24 : vector<8x1xi32> to vector<8x128xi32>
    %26 = arith.cmpi eq, %8, %25 : vector<8x128xi32>
    %27 = arith.extui %26 : vector<8x128xi1> to vector<8x128xi32>
    %28 = arith.sitofp %27 : vector<8x128xi32> to vector<8x128xf32>
    %29 = arith.truncf %28 : vector<8x128xf32> to vector<8x128xbf16>
    %30 = arith.addf %23, %29 : vector<8x128xbf16>
    %31 = vector.extract_strided_slice %3 {offsets = [0, 3], sizes = [8, 1], strides = [1, 1]} : vector<8x8xi32> to vector<8x1xi32>
    %32 = vector.broadcast %31 : vector<8x1xi32> to vector<8x128xi32>
    %33 = arith.cmpi eq, %8, %32 : vector<8x128xi32>
    %34 = arith.extui %33 : vector<8x128xi1> to vector<8x128xi32>
    %35 = arith.sitofp %34 : vector<8x128xi32> to vector<8x128xf32>
    %36 = arith.truncf %35 : vector<8x128xf32> to vector<8x128xbf16>
    %37 = arith.addf %30, %36 : vector<8x128xbf16>
    %38 = vector.extract_strided_slice %3 {offsets = [0, 4], sizes = [8, 1], strides = [1, 1]} : vector<8x8xi32> to vector<8x1xi32>
    %39 = vector.broadcast %38 : vector<8x1xi32> to vector<8x128xi32>
    %40 = arith.cmpi eq, %8, %39 : vector<8x128xi32>
    %41 = arith.extui %40 : vector<8x128xi1> to vector<8x128xi32>
    %42 = arith.sitofp %41 : vector<8x128xi32> to vector<8x128xf32>
    %43 = arith.truncf %42 : vector<8x128xf32> to vector<8x128xbf16>
    %44 = arith.addf %37, %43 : vector<8x128xbf16>
    %45 = vector.extract_strided_slice %3 {offsets = [0, 5], sizes = [8, 1], strides = [1, 1]} : vector<8x8xi32> to vector<8x1xi32>
    %46 = vector.broadcast %45 : vector<8x1xi32> to vector<8x128xi32>
    %47 = arith.cmpi eq, %8, %46 : vector<8x128xi32>
    %48 = arith.extui %47 : vector<8x128xi1> to vector<8x128xi32>
    %49 = arith.sitofp %48 : vector<8x128xi32> to vector<8x128xf32>
    %50 = arith.truncf %49 : vector<8x128xf32> to vector<8x128xbf16>
    %51 = arith.addf %44, %50 : vector<8x128xbf16>
    %52 = vector.extract_strided_slice %3 {offsets = [0, 6], sizes = [8, 1], strides = [1, 1]} : vector<8x8xi32> to vector<8x1xi32>
    %53 = vector.broadcast %52 : vector<8x1xi32> to vector<8x128xi32>
    %54 = arith.cmpi eq, %8, %53 : vector<8x128xi32>
    %55 = arith.extui %54 : vector<8x128xi1> to vector<8x128xi32>
    %56 = arith.sitofp %55 : vector<8x128xi32> to vector<8x128xf32>
    %57 = arith.truncf %56 : vector<8x128xf32> to vector<8x128xbf16>
    %58 = arith.addf %51, %57 : vector<8x128xbf16>
    %59 = vector.extract_strided_slice %3 {offsets = [0, 7], sizes = [8, 1], strides = [1, 1]} : vector<8x8xi32> to vector<8x1xi32>
    %60 = vector.broadcast %59 : vector<8x1xi32> to vector<8x128xi32>
    %61 = arith.cmpi eq, %8, %60 : vector<8x128xi32>
    %62 = arith.extui %61 : vector<8x128xi1> to vector<8x128xi32>
    %63 = arith.sitofp %62 : vector<8x128xi32> to vector<8x128xf32>
    %64 = arith.truncf %63 : vector<8x128xf32> to vector<8x128xbf16>
    %65 = arith.addf %58, %64 : vector<8x128xbf16>
    %66 = arith.index_cast %arg1 : i32 to index
    %c0_3 = arith.constant 0 : index
    %c0_4 = arith.constant 0 : index
    %67 = vector.load %arg8[%66, %c0_3, %c0_4] : memref<1x8x128xf32, #tpu.memory_space<vmem>>, vector<1x8x128xf32>
    %68 = vector.shape_cast %67 : vector<1x8x128xf32> to vector<8x128xf32>
    %c0_5 = arith.constant 0 : index
    %c0_6 = arith.constant 0 : index
    %69 = vector.load %arg4[%c0_5, %c0_6] : memref<128x128xbf16, #tpu.memory_space<vmem>>, vector<128x128xbf16>
    %cst_7 = arith.constant dense<0.000000e+00> : vector<8x128xf32>
    %70 = tpu.matmul %65, %69, %cst_7 {dimension_numbers = #tpu.dot_dimension_numbers<[1], [0], [0], [1], [0, 0, 1, 1], [], []>} : vector<8x128xbf16>, vector<128x128xbf16>, vector<8x128xf32> -> vector<8x128xf32>
    %71 = arith.addf %68, %70 : vector<8x128xf32>
    %72 = arith.index_cast %arg1 : i32 to index
    %c0_8 = arith.constant 0 : index
    %c0_9 = arith.constant 0 : index
    %73 = vector.load %arg8[%72, %c0_8, %c0_9] : memref<1x8x128xf32, #tpu.memory_space<vmem>>, vector<1x8x128xf32>
    %74 = vector.shape_cast %73 : vector<1x8x128xf32> to vector<8x128xf32>
    %75 = vector.shape_cast %71 : vector<8x128xf32> to vector<1x8x128xf32>
    tpu.vector_store %arg8[%72, %c0_8, %c0_9], %75 {strides = array<i32>} : memref<1x8x128xf32, #tpu.memory_space<vmem>>, vector<1x8x128xf32>,
    %c0_i32_10 = arith.constant 0 : i32
    %76 = arith.cmpi eq, %arg0, %c0_i32_10 : i32
    %77 = arith.extui %76 : i1 to i32
    %c0_i32_11 = arith.constant 0 : i32
    %78 = arith.cmpi ne, %77, %c0_i32_11 : i32
    scf.if %78 {
      %79 = arith.index_cast %arg1 : i32 to index
      %c0_12 = arith.constant 0 : index
      %c0_13 = arith.constant 0 : index
      %80 = vector.load %arg8[%79, %c0_12, %c0_13] : memref<1x8x128xf32, #tpu.memory_space<vmem>>, vector<1x8x128xf32>
      %81 = vector.shape_cast %80 : vector<1x8x128xf32> to vector<8x128xf32>
      %c0_14 = arith.constant 0 : index
      %c0_15 = arith.constant 0 : index
      %82 = vector.load %arg3[%c0_14, %c0_15] : memref<8x1xf32, #tpu.memory_space<vmem>>, vector<8x1xf32>
      %83 = vector.broadcast %82 : vector<8x1xf32> to vector<8x128xf32>
      %84 = arith.divf %81, %83 : vector<8x128xf32>
      %c0_16 = arith.constant 0 : index
      %c0_17 = arith.constant 0 : index
      %85 = vector.load %arg5[%c0_16, %c0_17] : memref<128x128xf32, #tpu.memory_space<vmem>>, vector<128x128xf32>
      %cst_18 = arith.constant dense<0.000000e+00> : vector<8x128xf32>
      %86 = tpu.matmul %84, %85, %cst_18 {dimension_numbers = #tpu.dot_dimension_numbers<[1], [0], [0], [1], [0, 0, 1, 1], [], []>} : vector<8x128xf32>, vector<128x128xf32>, vector<8x128xf32> -> vector<8x128xf32>
      %c0_19 = arith.constant 0 : index
      %c0_20 = arith.constant 0 : index
      %87 = vector.load %arg6[%c0_19, %c0_20] : memref<1x128xf32, #tpu.memory_space<vmem>>, vector<1x128xf32>
      %88 = vector.broadcast %87 : vector<1x128xf32> to vector<8x128xf32>
      %89 = arith.addf %86, %88 : vector<8x128xf32>
      %c0_21 = arith.constant 0 : index
      %c0_22 = arith.constant 0 : index
      %90 = vector.load %arg7[%c0_21, %c0_22] : memref<8x128xf32, #tpu.memory_space<vmem>>, vector<8x128xf32>
      tpu.vector_store %arg7[%c0_21, %c0_22], %89 {strides = array<i32>} : memref<8x128xf32, #tpu.memory_space<vmem>>, vector<8x128xf32>,
    } else {
    }
    return
  }
  func.func @transform_0(%arg0: i32, %arg1: i32) -> (i32, i32) {
    %c0_i32 = arith.constant 0 : i32
    %c0_i32_0 = arith.constant 0 : i32
    return %arg1, %c0_i32 : i32, i32
  }
  func.func @transform_1(%arg0: i32, %arg1: i32) -> (i32, i32) {
    %c0_i32 = arith.constant 0 : i32
    %c0_i32_0 = arith.constant 0 : i32
    return %arg1, %c0_i32 : i32, i32
  }
  func.func @transform_2(%arg0: i32, %arg1: i32) -> (i32, i32) {
    %c0_i32 = arith.constant 0 : i32
    %c0_i32_0 = arith.constant 0 : i32
    return %arg0, %c0_i32 : i32, i32
  }
  func.func @transform_3(%arg0: i32, %arg1: i32) -> (i32, i32) {
    %c0_i32 = arith.constant 0 : i32
    %c0_i32_0 = arith.constant 0 : i32
    %c0_i32_1 = arith.constant 0 : i32
    return %c0_i32, %c0_i32_0 : i32, i32
  }
  func.func @transform_4(%arg0: i32, %arg1: i32) -> (i32, i32) {
    %c0_i32 = arith.constant 0 : i32
    %c0_i32_0 = arith.constant 0 : i32
    %c0_i32_1 = arith.constant 0 : i32
    return %c0_i32, %c0_i32_0 : i32, i32
  }
  func.func @transform_5(%arg0: i32, %arg1: i32) -> (i32, i32) {
    %c0_i32 = arith.constant 0 : i32
    %c0_i32_0 = arith.constant 0 : i32
    return %arg1, %c0_i32 : i32, i32
  }
}

</mosaic_0001>

<bundles_post_ra>
// kernel: tpu_custom_call.1
= control target key start
LH: loop header
LB: loop body
LE: loop exit
PB: predicated region body
PF: predicated region fallthrough
CT: control target
= control target key end

     0   :  { %10 = vsyncpa [#allocation4], 0  ;;  %s700_s0 = inlined_call_operand.vmem [shape: s32[8,8], index: 0, kind: input, shape index: {}]   ;;  %s701_s1 = inlined_call_operand.vmem [shape: f32[8,1], index: 1, kind: input, shape index: {}]   ;;  %s702_s2 = inlined_call_operand.hbm [shape: bf16[128,128], index: 2, kind: input, shape index: {}]   ;;  %s703_s3 = inlined_call_operand.hbm [shape: f32[128,128], index: 3, kind: input, shape index: {}]   ;;  %s704_s4 = inlined_call_operand.vmem [shape: f32[1,128], index: 4, kind: input, shape index: {}]   ;;  %s705_s5 = inlined_call_operand.hbm [shape: f32[8,128], index: 5, kind: output, shape index: {}]  }
   0x1   :  { %11 = vsyncpa [#allocation7], 0 }
   0x2   :  { %12 = vsyncpa [#allocation5], 0  ;;  %s589_s18 = smov [#allocation3]   ;;  %s517_s22 = scalar_lea.hbm %s702_s2, 1024 }
   0x3   :  { %s22_s19 = sshll.u32 %s589_s18, 4  ;;  %p518_p0 = scmp.ne.s32.totalorder %s702_s2, %s517_s22  ;;  %s23_s19 = int_to_ptr.vmem [resolvable:$true] %s22_s19 }
   0x4   :  { %p521_p1 = scmp.lt.u32.totalorder %s517_s22, %s702_s2 }
   0x6   :  { %p523_p2 = pnand %p521_p1, %p518_p0 }
   0x8   :  { %526 = shalt.err (!%p523_p2)
}
   0x9   :  { %s527_s27 = scalar_lea.vmem %s23_s19, 1024  ;;  %p532_p4 = scmp.lt.s32.totalorder %s23_s19, %s23_s19 }
   0xa   :  { %p528_p3 = scmp.ne.s32.totalorder %s23_s19, %s527_s27  ;;  %p533_p5 = scmp.lt.s32.totalorder %s527_s27, %s527_s27 }
   0xc   :  { %p534_p6 = por %p533_p5, %p532_p4 }
   0xe   :  { %p535_p7 = pnand %p534_p6, %p528_p3 }
  0x10   :  { %538 = shalt.err (!%p535_p7)
}
  0x11   :  { %s590_s28 = smov 64   ;;  %s591_s29 = smov 4  }
  0x12   :  { %28 = dma.hbm_to_vmem [thread:$0]  %s702_s2, 1024, %s23_s19, [#allocation4], %s590_s28, %s590_s28, %s591_s29  }
  0x13   :  { %s592_s7 = smov [#allocation6]   ;;  %s539_s11 = scalar_lea.hbm %s703_s3, 2048 }
  0x14   :  { %s34_s8 = sshll.u32 %s592_s7, 4  ;;  %p540_p8 = scmp.ne.s32.totalorder %s703_s3, %s539_s11  ;;  %s35_s8 = int_to_ptr.vmem [resolvable:$true] %s34_s8 }
  0x15   :  { %p543_p9 = scmp.lt.u32.totalorder %s539_s11, %s703_s3 }
  0x17   :  { %p545_p10 = pnand %p543_p9, %p540_p8 }
  0x19   :  { %548 = shalt.err (!%p545_p10)
}
  0x1a   :  { %s549_s16 = scalar_lea.vmem %s35_s8, 2048  ;;  %p554_p12 = scmp.lt.s32.totalorder %s35_s8, %s35_s8 }
  0x1b   :  { %p550_p11 = scmp.ne.s32.totalorder %s35_s8, %s549_s16  ;;  %p555_p13 = scmp.lt.s32.totalorder %s549_s16, %s549_s16 }
  0x1d   :  { %p556_p0 = por %p555_p13, %p554_p12 }
  0x1f   :  { %p557_p1 = pnand %p556_p0, %p550_p11 }
  0x21   :  { %560 = shalt.err (!%p557_p1)
}
  0x22   :  { %s593_s2 = smov 128   ;;  %s594_s17 = smov 8  }
  0x23   :  { %40 = dma.hbm_to_vmem [thread:$0]  %s703_s3, 2048, %s35_s8, [#allocation7], %s593_s2, %s593_s2, %s594_s17  }
  0x24   :  { %583 = dma.done.wait [#allocation4], 1024  }
  0x25   :  { %584 = vsyncadd [#allocation4], 4294966272 }
  0x26   :  { %585 = dma.done.wait [#allocation7], 2048  }
  0x27   :  { %586 = vsyncadd [#allocation7], 4294965248  ;;  %v595_v0 = vmov 2   ;;  %v596_v1 = vmov 0   ;;  %v597_v2 = vmov 0.0   ;;  %v57_v3 = vld [vmem:[%s700_s0] sm:$0xff]  ;;  %v59_v41 = vlaneseq }
  0x28   :  { %500 = vset.pattern.permute.xlu1 %v595_v0  ;;  %498 = vset.pattern.permute.xlu0 %v596_v1  ;;  %v507_v4 = vld [vmem:[#allocation3] sm:$0xff]   ;;  %v508_v5 = vld [vmem:[#allocation3 + $0x8] sm:$0xff]   ;;  %v598_v6 = vmov 3   ;;  %v599_v7 = vmov 1   ;;  %v509_v8 = vld [vmem:[#allocation3 + $0x10] sm:$0xff]   ;;  %v600_v9 = vmov 4  }
  0x29   :  { %401 = vmatprep.subr.bf16.mxu0 %v597_v2  ;;  %80 = vperm.xlu1 %500, %v57_v3   ;;  %v601_v10 = vmov 5   ;;  %v510_v11 = vld [vmem:[#allocation3 + $0x18] sm:$0xff]   ;;  %v602_v12 = vmov 6   ;;  %v511_v13 = vld [vmem:[#allocation3 + $0x20] sm:$0xff]   ;;  %v603_v14 = vmov 7   ;;  %v512_v15 = vld [vmem:[#allocation3 + $0x28] sm:$0xff]  }
  0x2a   :  { %64 = vperm.xlu0 %498, %v57_v3   ;;  %402 = vmatpush3.bf16.msra.mxu0 %v507_v4  ;;  %v513_v16 = vld [vmem:[#allocation3 + $0x30] sm:$0xff]   ;;  %vm604_vm0 = vmmov 0   ;;  %v240_v17 = vld [vmem:[%s701_s1] sm:$0xff]  ;;  %v249_v19 = vld [vmem:[#allocation6 + $0x8] sm:$0xff]  ;;  %v605_v24 = vmov 0.0|0.0   ;;  %v60_v42 = vand.u32 127, %v59_v41 }
  0x2b   :  { %403 = vmatprep.subr.bf16.mxu0 %v597_v2  ;;  %417 = vmatprep.mubr.msk.bf16.mxu0 %vm604_vm0, %v597_v2  ;;  %v248_v18 = vld [vmem:[#allocation6] sm:$0xff]  ;;  %v514_v20 = vld [vmem:[#allocation3 + $0x38] sm:$0xff]   ;;  %v250_v22 = vld [vmem:[#allocation6 + $0x10] sm:$0xff]  ;;  %s606_s23 = smov [#allocation8]  }
  0x2c   :  { %453 = vmatprep.mubr.msk.f32.mxu1 %vm604_vm0, %v597_v2  ;;  %v457_v21 = vpack.c.bf16 %v249_v19, %v248_v18  ;;  %v251_v23 = vld [vmem:[#allocation6 + $0x18] sm:$0xff]  ;;  %456 = vmatprep.subr.bf16.mxu1 %v605_v24  ;;  %v252_v26 = vld [vmem:[#allocation6 + $0x20] sm:$0xff]  ;;  %v253_v27 = vld [vmem:[#allocation6 + $0x28] sm:$0xff]  ;;  %s348_s24 = sshll.u32 %s606_s23, 4  ;;  %s349_s24 = int_to_ptr.vmem [resolvable:$true] %s348_s24 }
  0x2d   :  { %501 = vset.pattern.permute.xlu1 %v598_v6  ;;  %v460_v25 = vpack.c.bf16 %v251_v23, %v250_v22  ;;  %v463_v28 = vpack.c.bf16 %v253_v27, %v252_v26  ;;  %v254_v29 = vld [vmem:[#allocation6 + $0x30] sm:$0xff]  ;;  %v255_v30 = vld [vmem:[#allocation6 + $0x38] sm:$0xff]  ;;  %v256_v32 = vld [vmem:[#allocation6 + $0x40] sm:$0xff]  ;;  %s561_s25 = scalar_lea.vmem %s349_s24, 128  ;;  %p566_p3 = scmp.lt.s32.totalorder %s349_s24, %s349_s24 }
  0x2e   :  { %499 = vset.pattern.permute.xlu0 %v599_v7  ;;  %88 = vperm.xlu1 %501, %v57_v3   ;;  %v466_v31 = vpack.c.bf16 %v255_v30, %v254_v29  ;;  %v257_v33 = vld [vmem:[#allocation6 + $0x48] sm:$0xff]  ;;  %v258_v35 = vld [vmem:[#allocation6 + $0x50] sm:$0xff]  ;;  %v259_v36 = vld [vmem:[#allocation6 + $0x58] sm:$0xff]  ;;  %p562_p2 = scmp.ne.s32.totalorder %s349_s24, %s561_s25  ;;  %p567_p4 = scmp.lt.s32.totalorder %s561_s25, %s561_s25 }
  0x2f   :  { %72 = vperm.xlu0 %499, %v57_v3   ;;  %404 = vmatpush3.bf16.msra.mxu0 %v508_v5  ;;  %v469_v34 = vpack.c.bf16 %v257_v33, %v256_v32  ;;  %v472_v37 = vpack.c.bf16 %v259_v36, %v258_v35  ;;  %v260_v38 = vld [vmem:[#allocation6 + $0x60] sm:$0xff]  ;;  %v261_v39 = vld [vmem:[#allocation6 + $0x68] sm:$0xff] }
  0x30   :  { %405 = vmatprep.subr.bf16.mxu0 %v597_v2  ;;  %458 = vmatpush3.bf16.msra.mxu1 %v457_v21  ;;  %v475_v40 = vpack.c.bf16 %v261_v39, %v260_v38  ;;  %p568_p5 = por %p567_p4, %p566_p3 }
  0x31   :  { %459 = vmatprep.subr.bf16.mxu1 %v605_v24 }
  0x32   :  { %502 = vset.pattern.permute.xlu1 %v600_v9  ;;  %p569_p6 = pnand %p568_p5, %p562_p2 }
  0x33   :  { %503 = vset.pattern.permute.xlu0 %v601_v10  ;;  %96 = vperm.xlu1 %502, %v57_v3  }
  0x34   :  { %104 = vperm.xlu0 %503, %v57_v3   ;;  %406 = vmatpush3.bf16.msra.mxu0 %v509_v8 }
  0x35   :  { %407 = vmatprep.subr.bf16.mxu0 %v597_v2  ;;  %461 = vmatpush3.bf16.msra.mxu1 %v460_v25 }
  0x36   :  { %462 = vmatprep.subr.bf16.mxu1 %v605_v24 }
  0x37   :  { %504 = vset.pattern.permute.xlu1 %v602_v12  ;;  %v262_v12 = vld [vmem:[#allocation6 + $0x70] sm:$0xff] }
  0x38   :  { %506 = vset.pattern.permute.xlu0 %v596_v1  ;;  %112 = vperm.xlu1 %504, %v57_v3  }
  0x39   :  { %408 = vmatpush3.bf16.msra.mxu0 %v510_v11  ;;  %243 = vperm.xlu0 %506, %v240_v17  }
  0x3a   :  { %409 = vmatprep.subr.bf16.mxu0 %v597_v2  ;;  %464 = vmatpush3.bf16.msra.mxu1 %v463_v28 }
  0x3b   :  { %465 = vmatprep.subr.bf16.mxu1 %v605_v24 }
  0x3c   :  { %505 = vset.pattern.permute.xlu1 %v603_v14 }
  0x3d   :  { %410 = vmatpush3.bf16.msra.mxu0 %v511_v13  ;;  %120 = vperm.xlu1 %505, %v57_v3   ;;  %v263_v13 = vld [vmem:[#allocation6 + $0x78] sm:$0xff] }
  0x3e   :  { %411 = vmatprep.subr.bf16.mxu0 %v597_v2  ;;  %467 = vmatpush3.bf16.msra.mxu1 %v466_v31  ;;  %v478_v14 = vpack.c.bf16 %v263_v13, %v262_v12 }
  0x3f   :  { %468 = vmatprep.subr.bf16.mxu1 %v605_v24 }
  0x41   :  { %412 = vmatpush3.bf16.msra.mxu0 %v512_v15 }
  0x42   :  { %413 = vmatprep.subr.bf16.mxu0 %v597_v2  ;;  %470 = vmatpush3.bf16.msra.mxu1 %v469_v34 }
  0x43   :  { %471 = vmatprep.subr.bf16.mxu1 %v605_v24 }
  0x45   :  { %414 = vmatpush3.bf16.msra.mxu0 %v513_v16 }
  0x46   :  { %415 = vmatprep.subr.bf16.mxu0 %v597_v2  ;;  %473 = vmatpush3.bf16.msra.mxu1 %v472_v37 }
  0x47   :  { %474 = vmatprep.subr.bf16.mxu1 %v605_v24 }
  0x49   :  { %416 = vmatpush3.bf16.msra.mxu0 %v514_v20 }
  0x4a   :  { %476 = vmatpush3.bf16.msra.mxu1 %v475_v40 }
  0x4b   :  { %477 = vmatprep.subr.bf16.mxu1 %v605_v24 }
  0x4e   :  { %479 = vmatpush3.bf16.msra.mxu1 %v478_v14 }
  0xa8   :  { %v81_v43 = vpop.permute.xlu1 %80 }
  0xa9   :  { %v65_v44 = vpop.permute.xlu0 %64  ;;  %vm82_vm2 = vcmp.eq.s32.totalorder %v60_v42, %v81_v43 }
  0xaa   :  { %vm66_vm1 = vcmp.eq.s32.totalorder %v60_v42, %v65_v44  ;;  %v360_v50 = vsel %vm82_vm2, 1.0, %v597_v2 }
  0xab   :  { %v358_v45 = vsel %vm66_vm1, 1.0, %v597_v2  ;;  %v85_v54 = vpack.c.bf16 %v360_v50, %v360_v50 }
  0xac   :  { %v69_v46 = vpack.c.bf16 %v358_v45, %v358_v45 }
  0xad   :  { %v89_v47 = vpop.permute.xlu1 %88 }
  0xae   :  { %v73_v48 = vpop.permute.xlu0 %72  ;;  %v70_v49 = vadd.bf16 0, %v69_v46  ;;  %vm90_vm3 = vcmp.eq.s32.totalorder %v60_v42, %v89_v47 }
  0xaf   :  { %vm74_vm4 = vcmp.eq.s32.totalorder %v60_v42, %v73_v48  ;;  %v361_v53 = vsel %vm90_vm3, 1.0, %v597_v2 }
  0xb0   :  { %v359_v51 = vsel %vm74_vm4, 1.0, %v597_v2  ;;  %v93_v58 = vpack.c.bf16 %v361_v53, %v361_v53 }
  0xb1   :  { %v77_v52 = vpack.c.bf16 %v359_v51, %v359_v51 }
  0xb2   :  { %v97_v56 = vpop.permute.xlu1 %96 }
  0xb3   :  { %v78_v55 = vadd.bf16 %v77_v52, %v70_v49  ;;  %v105_v57 = vpop.permute.xlu0 %104  ;;  %vm98_vm5 = vcmp.eq.s32.totalorder %v60_v42, %v97_v56 }
  0xb4   :  { %vm106_vm6 = vcmp.eq.s32.totalorder %v60_v42, %v105_v57  ;;  %v362_v60 = vsel %vm98_vm5, 1.0, %v597_v2 }
  0xb5   :  { %v86_v59 = vadd.bf16 %v85_v54, %v78_v55  ;;  %v363_v61 = vsel %vm106_vm6, 1.0, %v597_v2  ;;  %v101_v62 = vpack.c.bf16 %v362_v60, %v362_v60 }
  0xb6   :  { %v109_v0 = vpack.c.bf16 %v363_v61, %v363_v61 }
  0xb7   :  { %v94_v63 = vadd.bf16 %v93_v58, %v86_v59  ;;  %v113_v1 = vpop.permute.xlu1 %112 }
  0xb8   :  { %vm114_vm7 = vcmp.eq.s32.totalorder %v60_v42, %v113_v1  ;;  %v244_v15 = vpop.permute.xlu0 %243 }
  0xb9   :  { %v102_v3 = vadd.bf16 %v101_v62, %v94_v63  ;;  %v364_v4 = vsel %vm114_vm7, 1.0, %v597_v2  ;;  %515 = vrcp.f32 %v244_v15 }
  0xba   :  { %v117_v6 = vpack.c.bf16 %v364_v4, %v364_v4 }
  0xbb   :  { %v110_v5 = vadd.bf16 %v109_v0, %v102_v3 }
  0xbc   :  { %v121_v7 = vpop.permute.xlu1 %120 }
  0xbd   :  { %vm122_vm8 = vcmp.eq.s32.totalorder %v60_v42, %v121_v7  ;;  %v118_v9 = vadd.bf16 %v117_v6, %v110_v5 }
  0xbe   :  { %v365_v8 = vsel %vm122_vm8, 1.0, %v597_v2  ;;  %v374_v2 = vld [vmem:[%s704_s4] ss:$0 sm:$0xff] }
  0xbf   :  { %v125_v10 = vpack.c.bf16 %v365_v8, %v365_v8 }
  0xc1   :  { %v126_v11 = vadd.bf16 %v125_v10, %v118_v9 }
  0xc3   :  { %418 = vmatmul.mubr.bf16.vlgmr.msra.gmra.mrb[0].mxu0 %v126_v11  ;;  %v516_v16 = vpop.eup %515 }
 0x196   :  { %v228_v17 = vpop.f32.mrb[0].mxu0 }
 0x197   :  { %v247_v18 = vmul.f32 %v516_v16, %v228_v17  ;;  %v419_v19 = vpop.f32.mrb[1].mxu0 }
 0x198   :  { %v231_v20 = vpop.f32.mrb[2].mxu0 }
 0x199   :  { %v420_v21 = vpop.f32.mrb[3].mxu0  ;;  %454 = vmatmul.mubr.f32.vlgmr.msra.gmra.mrb[0].mxu1 %v247_v18 }
 0x26c   :  { %v337_v22 = vpop.f32.mrb[0].mxu1 }
 0x26d   :  { %v338_v23 = vadd.f32 %v374_v2, %v337_v22  ;;  %v455_v24 = vpop.f32.mrb[1].mxu1 }
 0x26f   :  { %341 = vst [vmem:[#allocation8] sm:$0xff] %v338_v23 }
 0x270   :  { %572 = shalt.err (!%p569_p6)
}
 0x271   :  { %s573_s28 = scalar_lea.hbm %s705_s5, 128 }
 0x272   :  { %p574_p7 = scmp.ne.s32.totalorder %s705_s5, %s573_s28  ;;  %p577_p8 = scmp.lt.u32.totalorder %s573_s28, %s705_s5 }
 0x274   :  { %p579_p9 = pnand %p577_p8, %p574_p7 }
 0x276   :  { %582 = shalt.err (!%p579_p9)
}
 0x277   :  { %351 = dma.vmem_to_hbm [thread:$0]  %s349_s24, 128, %s705_s5, [#allocation5]  }
 0x278   :  { %587 = dma.done.wait [#allocation5], 128  }
 0x279   :  { %588 = vsyncadd [#allocation5], 4294967168 }
 0x27a   :  { %355 = vsyncpa [#allocation4], 1 }
 0x27b   :  { %356 = vsyncpa [#allocation7], 1 }
 0x27c   :  { %357 = vsyncpa [#allocation5], 1 }

</bundles_post_ra>
